<compile_context>
chip_gen: v7x
topology: tpu7x:2x2x1
jax: 0.10.0
libtpu: 0.0.40
codegen_flags: <defaults>
</compile_context>

<pallas_src>
import functools

import jax
import jax.numpy as jnp
from jax.experimental import pallas as pl
from jax.experimental.pallas import tpu as pltpu


def _round_up(x, m):
    return ((x + m - 1) // m) * m


# ----------------------------------------------------------------------------
# Pallas kernel: fused matmul / softmax hot path, one row tile per grid step.
# ----------------------------------------------------------------------------
def vector_feature_kernel(
    roi_ref, logits_ref, box9_ref,          # row-tiled inputs
    wp_ref, bp_ref,                         # pos_embed folded to one (9,128) affine
    w_roi_ref, w_pos_ref, b_cat_ref,        # [lin_obj | lin_obj_cyx] concatenated weights
    wemb_ref,                               # emb @ wc_emb folded weight, (K, Hp)
    wout_ref, bout_ref,                     # out_obj, padded to (Hp, Kp)
    obj_dists_ref, obj_pre_rep_ref,         # lane-dense outputs
):
    f32 = jnp.float32
    roi = roi_ref[...]
    logits = logits_ref[...]
    box9 = box9_ref[...]

    # pos_embed = ReLU(box9 @ wp + bp)   (Linear -> BN(eval) -> Linear folded at init)
    pos = jnp.maximum(
        jnp.dot(box9, wp_ref[...], preferred_element_type=f32) + bp_ref[...], 0.0
    )

    # softmax(logits) @ obj_embed1 @ Wc_emb, with the two weight matmuls pre-folded:
    #   (exp(l - m) @ wemb) * 1/rowsum(exp(l - m))
    m = jnp.max(logits, axis=1, keepdims=True)
    e = jnp.exp(logits - m)
    inv_s = pl.reciprocal(jnp.sum(e, axis=1, keepdims=True), approx=False)
    emb_contrib = jnp.dot(e, wemb_ref[...], preferred_element_type=f32) * inv_s  # (tn, Hp)

    # One lane-dense matmul pair yields both lin_obj and the roi/pos part of lin_obj_cyx.
    both = (
        jnp.dot(roi, w_roi_ref[...], preferred_element_type=f32)
        + jnp.dot(pos, w_pos_ref[...], preferred_element_type=f32)
        + b_cat_ref[...]
    )                                                                            # (tn, 2*Hp)
    hp = obj_pre_rep_ref.shape[1]
    obj_pre_rep_ref[...] = both[:, :hp]
    rep_pred = both[:, hp:] + emb_contrib                                        # (tn, Hp)

    obj_dists_ref[...] = (
        jnp.dot(rep_pred, wout_ref[...], preferred_element_type=f32) + bout_ref[...]
    )


# ----------------------------------------------------------------------------
# Wrapper: row tiling, padding to lane-dense widths, argmax outside the kernel.
# ----------------------------------------------------------------------------
def vector_feature_forward(roi, logits, box9, folded, *, hidden_dim, num_classes,
                           block_rows=256):
    N, C = roi.shape
    K = logits.shape[1]
    B9 = box9.shape[1]
    Hp = folded["w_roi"].shape[1] // 2
    Kp = folded["wout"].shape[1]
    f32 = jnp.float32

    # Row tile: multiple of 8, capped at block_rows; pad N up to a whole number of tiles.
    tn = min(_round_up(block_rows, 8), _round_up(max(N, 1), 8))
    n_pad = _round_up(max(N, 1), tn)

    def pad_rows(x):
        return jnp.pad(x, ((0, n_pad - N), (0, 0))) if n_pad != N else x

    roi_p, logits_p, box9_p = pad_rows(roi), pad_rows(logits), pad_rows(box9)

    weights = (
        folded["wp"], folded["bp"],
        folded["w_roi"], folded["w_pos"], folded["b_cat"],
        folded["wemb"],
        folded["wout"], folded["bout"],
    )

    def row_spec(cols):
        return pl.BlockSpec((tn, cols), lambda i: (i, 0))

    def full_spec(a):
        return pl.BlockSpec(a.shape, lambda i: (0, 0))

    in_specs = [row_spec(C), row_spec(K), row_spec(B9)] + [full_spec(w) for w in weights]
    out_specs = (
        pl.BlockSpec((tn, Kp), lambda i: (i, 0)),
        pl.BlockSpec((tn, Hp), lambda i: (i, 0)),
    )

    # Advisory cost estimate for XLA's scheduler.
    flops = 2 * n_pad * (B9 * 128 + C * 2 * Hp + 128 * 2 * Hp + K * Hp + Hp * Kp)
    bytes_in = sum(int(x.size) * x.dtype.itemsize
                   for x in (roi_p, logits_p, box9_p) + weights)
    bytes_out = n_pad * (Kp + Hp) * 4
    cost = pl.CostEstimate(flops=flops, transcendentals=n_pad * K,
                           bytes_accessed=bytes_in + bytes_out)

    # Scoped VMEM sized to the real working set (weights + double-buffered row tiles).
    weight_bytes = sum(int(w.size) * w.dtype.itemsize for w in weights)
    tile_bytes = tn * (C + K + B9 + Kp + Hp) * 4
    vmem_limit = int(min(64 * 2**20, max(32 * 2**20, 2 * (weight_bytes + 2 * tile_bytes))))

    obj_dists_p, obj_pre_rep_p = pl.pallas_call(
        vector_feature_kernel,
        out_shape=(
            jax.ShapeDtypeStruct((n_pad, Kp), f32),
            jax.ShapeDtypeStruct((n_pad, Hp), f32),
        ),
        grid=(n_pad // tn,),
        in_specs=in_specs,
        out_specs=out_specs,
        compiler_params=pltpu.CompilerParams(
            dimension_semantics=("parallel",),
            vmem_limit_bytes=vmem_limit,
        ),
        cost_estimate=cost,
    )(roi_p, logits_p, box9_p, *weights)

    obj_dists = obj_dists_p[:N, :num_classes]
    obj_pre_rep = obj_pre_rep_p[:N, :hidden_dim]
    # sgcls/predcls eval prediction path: argmax over foreground classes (trivial, kept in XLA
    # so the kernel does not need a lane-width-1 output or extra cross-lane reductions).
    obj_preds = (jnp.argmax(obj_dists[:, 1:], axis=1) + 1).astype(jnp.int32)
    return obj_dists, obj_preds, obj_pre_rep


# ----------------------------------------------------------------------------
# Parameter folding (done once, outside the kernel).
# ----------------------------------------------------------------------------
def fold_params(p, in_channels, embed_dim=300, eps=1e-5, weight_dtype=jnp.float32):
    """Fold module parameters into the packed / padded form consumed by the kernel."""
    C = in_channels
    H = p["wo"].shape[1]
    K = p["wout"].shape[1]
    Hp = _round_up(H, 128)
    Kp = _round_up(K, 128)

    # BatchNorm1d (eval) folded into Linear(9,32); then both pos_embed Linears folded
    # into a single (9,128) affine (everything before the ReLU is affine).
    bn_scale = p["gamma"] / jnp.sqrt(p["run_var"] + eps)
    bn_bias = p["beta"] - p["run_mean"] * bn_scale
    w1f = p["w1"] * bn_scale
    b1f = p["b1"] * bn_scale + bn_bias
    wp = w1f @ p["w2"]                    # (9, 128)
    bp = b1f @ p["w2"] + p["b2"]          # (1, 128)

    def pad_cols(x, n):
        return jnp.pad(x, ((0, 0), (0, n - x.shape[1])))

    wo_roi, wo_pos = p["wo"][:C], p["wo"][C:]
    wc_roi = p["wc"][:C]
    wc_emb = p["wc"][C:C + embed_dim]
    wc_pos = p["wc"][C + embed_dim:]

    w_roi = jnp.concatenate([pad_cols(wo_roi, Hp), pad_cols(wc_roi, Hp)], axis=1)  # (C, 2Hp)
    w_pos = jnp.concatenate([pad_cols(wo_pos, Hp), pad_cols(wc_pos, Hp)], axis=1)  # (128, 2Hp)
    b_cat = jnp.concatenate([pad_cols(p["bo"], Hp), pad_cols(p["bc"], Hp)], axis=1)
    wemb = pad_cols(p["emb"] @ wc_emb, Hp)                                         # (K, Hp)
    wout = jnp.pad(p["wout"], ((0, Hp - H), (0, Kp - K)))                          # (Hp, Kp)
    bout = pad_cols(p["bout"], Kp)

    wcast = lambda x: x.astype(weight_dtype)   # bf16 here for v7x; biases stay f32
    return dict(
        wp=wcast(wp), bp=bp.astype(jnp.float32),
        w_roi=wcast(w_roi), w_pos=wcast(w_pos), b_cat=b_cat.astype(jnp.float32),
        wemb=wcast(wemb), wout=wcast(wout), bout=bout.astype(jnp.float32),
    )


# ----------------------------------------------------------------------------
# Glue (plain JAX): encode_box_info, synthetic module parameters, reference.
# ----------------------------------------------------------------------------
def encode_box_info(boxes, img_sizes):
    """boxes: (N,4) xyxy, img_sizes: (N,2) = (width, height) per box. Returns (N,9)."""
    wid = img_sizes[:, 0:1]
    hei = img_sizes[:, 1:2]
    wh = boxes[:, 2:4] - boxes[:, 0:2] + 1.0
    xy = boxes[:, 0:2] + 0.5 * wh
    w, h = wh[:, 0:1], wh[:, 1:2]
    x, y = xy[:, 0:1], xy[:, 1:2]
    x1, y1, x2, y2 = boxes[:, 0:1], boxes[:, 1:2], boxes[:, 2:3], boxes[:, 3:4]
    return jnp.concatenate(
        [w / wid, h / hei, x / wid, y / hei, x1 / wid, y1 / hei, x2 / wid, y2 / hei,
         (w * h) / (wid * hei)],
        axis=-1,
    )


def init_params(key, in_channels, num_obj_classes, hidden_dim, embed_dim=300):
    ks = jax.random.split(key, 10)
    f32 = jnp.float32

    def lin(k, fan_in, fan_out):
        kw, kb = jax.random.split(k)
        w = jax.random.normal(kw, (fan_in, fan_out), f32) * (1.0 / jnp.sqrt(fan_in))
        b = jax.random.normal(kb, (1, fan_out), f32) * 0.01
        return w, b

    emb = jax.random.normal(ks[0], (num_obj_classes, embed_dim), f32) * 0.1  # obj_embed1.weight
    w1, b1 = lin(ks[1], 9, 32)
    # BatchNorm1d(32) eval-mode parameters / running stats (non-trivial so the fold is tested)
    gamma = 1.0 + 0.1 * jax.random.normal(ks[2], (1, 32), f32)
    beta = 0.05 * jax.random.normal(ks[3], (1, 32), f32)
    run_mean = 0.1 * jax.random.normal(ks[4], (1, 32), f32)
    run_var = 1.0 + 0.1 * jnp.abs(jax.random.normal(ks[5], (1, 32), f32))
    w2, b2 = lin(ks[6], 32, 128)
    wo, bo = lin(ks[7], in_channels + 128, hidden_dim)                       # lin_obj
    wc, bc = lin(ks[8], in_channels + embed_dim + 128, hidden_dim)           # lin_obj_cyx
    wout, bout = lin(ks[9], hidden_dim, num_obj_classes)                     # out_obj
    return dict(emb=emb, w1=w1, b1=b1, gamma=gamma, beta=beta, run_mean=run_mean,
                run_var=run_var, w2=w2, b2=b2, wo=wo, bo=bo, wc=wc, bc=bc,
                wout=wout, bout=bout)


def reference_forward(roi, logits, box9, p, in_channels, eps=1e-5):
    """Pure-JAX reference replicating the PyTorch module (sgcls eval path)."""
    probs = jax.nn.softmax(logits, axis=1)
    obj_embed = probs @ p["emb"]
    h1 = box9 @ p["w1"] + p["b1"]
    h1 = (h1 - p["run_mean"]) / jnp.sqrt(p["run_var"] + eps) * p["gamma"] + p["beta"]
    pos = jnp.maximum(h1 @ p["w2"] + p["b2"], 0.0)
    obj_pre_rep = jnp.concatenate([roi, pos], -1) @ p["wo"] + p["bo"]
    rep_pred = jnp.concatenate([roi, obj_embed, pos], -1) @ p["wc"] + p["bc"]
    obj_dists = rep_pred @ p["wout"] + p["bout"]
    obj_preds = (jnp.argmax(obj_dists[:, 1:], axis=1) + 1).astype(jnp.int32)
    return obj_dists, obj_preds, obj_pre_rep


# TODO(synk): nms_per_cls (sgdet eval path) is a sequential, data-dependent NumPy NMS loop with
# no clean Pallas equivalent; only the sgcls/predcls prediction path is implemented in-kernel.

if __name__ == "__main__":
    key = jax.random.PRNGKey(0)
    k_roi, k_log, k_box, k_sz, k_par = jax.random.split(key, 5)

    N = 16            # total objects across proposals
    in_channels = 64  # roi feature dim
    num_obj_classes = 32
    hidden_dim = 64

    roi_features = jax.random.normal(k_roi, (N, in_channels), jnp.float32)
    obj_logits = jax.random.normal(k_log, (N, num_obj_classes), jnp.float32)

    # synthetic xyxy boxes inside a 640x480 image
    xy1 = jax.random.uniform(k_box, (N, 2), jnp.float32, 0.0, 300.0)
    wh = jax.random.uniform(k_sz, (N, 2), jnp.float32, 10.0, 150.0)
    boxes = jnp.concatenate([xy1, xy1 + wh], axis=-1)
    img_sizes = jnp.broadcast_to(jnp.array([[640.0, 480.0]], jnp.float32), (N, 2))
    box9 = encode_box_info(boxes, img_sizes)

    raw = init_params(k_par, in_channels, num_obj_classes, hidden_dim)
    folded = fold_params(raw, in_channels)   # weight_dtype=jnp.bfloat16 for v7x prod shapes

    fwd = functools.partial(vector_feature_forward,
                            hidden_dim=hidden_dim, num_classes=num_obj_classes,
                            block_rows=256)
    obj_dists, obj_preds, obj_pre_rep = fwd(roi_features, obj_logits, box9, folded)
    jax.block_until_ready((obj_dists, obj_preds, obj_pre_rep))

    # correctness check against the unfused pure-JAX reference
    ref_dists, ref_preds, ref_rep = reference_forward(
        roi_features, obj_logits, box9, raw, in_channels)
    assert obj_dists.shape == (N, num_obj_classes)
    assert obj_preds.shape == (N,)
    assert obj_pre_rep.shape == (N, hidden_dim)
    assert jnp.allclose(obj_dists, ref_dists, atol=2e-4, rtol=2e-4)
    assert jnp.allclose(obj_pre_rep, ref_rep, atol=2e-4, rtol=2e-4)
    assert jnp.all(obj_preds == ref_preds)

    print("KERNEL_OK")
</pallas_src>

<mosaic_0001>
module attributes {stable_mosaic.version = 11 : i64} {
  func.func @vector_feature_kernel(%arg0: i32, %arg1: memref<16x64xf32, #tpu.memory_space<vmem>>, %arg2: memref<16x32xf32, #tpu.memory_space<vmem>>, %arg3: memref<16x9xf32, #tpu.memory_space<vmem>>, %arg4: memref<9x128xf32, #tpu.memory_space<vmem>>, %arg5: memref<1x128xf32, #tpu.memory_space<vmem>>, %arg6: memref<64x256xf32, #tpu.memory_space<vmem>>, %arg7: memref<128x256xf32, #tpu.memory_space<vmem>>, %arg8: memref<1x256xf32, #tpu.memory_space<vmem>>, %arg9: memref<32x128xf32, #tpu.memory_space<vmem>>, %arg10: memref<128x128xf32, #tpu.memory_space<vmem>>, %arg11: memref<1x128xf32, #tpu.memory_space<vmem>>, %arg12: memref<16x128xf32, #tpu.memory_space<vmem>>, %arg13: memref<16x128xf32, #tpu.memory_space<vmem>>) attributes {dimension_semantics = [#tpu.dimension_semantics<parallel>], iteration_bounds = array<i64: 1>, scalar_prefetch = 0 : i64, scratch_operands = 0 : i64, tpu.core_type = #tpu.core_type<tc>, window_params = [{transform_indices = @transform_0, window_bounds = array<i64: 16, 64>}, {transform_indices = @transform_1, window_bounds = array<i64: 16, 32>}, {transform_indices = @transform_2, window_bounds = array<i64: 16, 9>}, {pipeline_mode = #tpu.pipeline_mode<synchronous>, transform_indices = @transform_3, window_bounds = array<i64: 9, 128>}, {pipeline_mode = #tpu.pipeline_mode<synchronous>, transform_indices = @transform_4, window_bounds = array<i64: 1, 128>}, {pipeline_mode = #tpu.pipeline_mode<synchronous>, transform_indices = @transform_5, window_bounds = array<i64: 64, 256>}, {pipeline_mode = #tpu.pipeline_mode<synchronous>, transform_indices = @transform_6, window_bounds = array<i64: 128, 256>}, {pipeline_mode = #tpu.pipeline_mode<synchronous>, transform_indices = @transform_7, window_bounds = array<i64: 1, 256>}, {pipeline_mode = #tpu.pipeline_mode<synchronous>, transform_indices = @transform_8, window_bounds = array<i64: 32, 128>}, {pipeline_mode = #tpu.pipeline_mode<synchronous>, transform_indices = @transform_9, window_bounds = array<i64: 128, 128>}, {pipeline_mode = #tpu.pipeline_mode<synchronous>, transform_indices = @transform_10, window_bounds = array<i64: 1, 128>}, {transform_indices = @transform_11, window_bounds = array<i64: 16, 128>}, {transform_indices = @transform_12, window_bounds = array<i64: 16, 128>}]} {
    %c0 = arith.constant 0 : index
    %c0_0 = arith.constant 0 : index
    %0 = vector.load %arg1[%c0, %c0_0] : memref<16x64xf32, #tpu.memory_space<vmem>>, vector<16x64xf32>
    %c0_1 = arith.constant 0 : index
    %c0_2 = arith.constant 0 : index
    %1 = vector.load %arg2[%c0_1, %c0_2] : memref<16x32xf32, #tpu.memory_space<vmem>>, vector<16x32xf32>
    %c0_3 = arith.constant 0 : index
    %c0_4 = arith.constant 0 : index
    %2 = vector.load %arg3[%c0_3, %c0_4] : memref<16x9xf32, #tpu.memory_space<vmem>>, vector<16x9xf32>
    %c0_5 = arith.constant 0 : index
    %c0_6 = arith.constant 0 : index
    %3 = vector.load %arg4[%c0_5, %c0_6] : memref<9x128xf32, #tpu.memory_space<vmem>>, vector<9x128xf32>
    %cst = arith.constant dense<0.000000e+00> : vector<16x128xf32>
    %4 = tpu.matmul %2, %3, %cst {dimension_numbers = #tpu.dot_dimension_numbers<[1], [0], [0], [1], [0, 0, 1, 1], [], []>} : vector<16x9xf32>, vector<9x128xf32>, vector<16x128xf32> -> vector<16x128xf32>
    %c0_7 = arith.constant 0 : index
    %c0_8 = arith.constant 0 : index
    %5 = vector.load %arg5[%c0_7, %c0_8] : memref<1x128xf32, #tpu.memory_space<vmem>>, vector<1x128xf32>
    %6 = vector.broadcast %5 : vector<1x128xf32> to vector<16x128xf32>
    %7 = arith.addf %4, %6 : vector<16x128xf32>
    %cst_9 = arith.constant 0.000000e+00 : f32
    %8 = vector.broadcast %cst_9 : f32 to vector<16x128xf32>
    %9 = arith.maximumf %7, %8 : vector<16x128xf32>
    %cst_10 = arith.constant dense<0xFF800000> : vector<16xf32>
    %10 = vector.multi_reduction <maximumf>, %1, %cst_10 [1] : vector<16x32xf32> to vector<16xf32>
    %11 = vector.shape_cast %10 : vector<16xf32> to vector<16x1xf32>
    %12 = vector.broadcast %11 : vector<16x1xf32> to vector<16x32xf32>
    %13 = arith.subf %1, %12 : vector<16x32xf32>
    %14 = math.exp %13 : vector<16x32xf32>
    %cst_11 = arith.constant dense<0.000000e+00> : vector<16xf32>
    %15 = vector.multi_reduction <add>, %14, %cst_11 [1] : vector<16x32xf32> to vector<16xf32>
    %16 = vector.shape_cast %15 : vector<16xf32> to vector<16x1xf32>
    %17 = tpu.reciprocal %16 : vector<16x1xf32> -> vector<16x1xf32>
    %c0_12 = arith.constant 0 : index
    %c0_13 = arith.constant 0 : index
    %18 = vector.load %arg9[%c0_12, %c0_13] : memref<32x128xf32, #tpu.memory_space<vmem>>, vector<32x128xf32>
    %cst_14 = arith.constant dense<0.000000e+00> : vector<16x128xf32>
    %19 = tpu.matmul %14, %18, %cst_14 {dimension_numbers = #tpu.dot_dimension_numbers<[1], [0], [0], [1], [0, 0, 1, 1], [], []>} : vector<16x32xf32>, vector<32x128xf32>, vector<16x128xf32> -> vector<16x128xf32>
    %20 = vector.broadcast %17 : vector<16x1xf32> to vector<16x128xf32>
    %21 = arith.mulf %19, %20 : vector<16x128xf32>
    %c0_15 = arith.constant 0 : index
    %c0_16 = arith.constant 0 : index
    %22 = vector.load %arg6[%c0_15, %c0_16] : memref<64x256xf32, #tpu.memory_space<vmem>>, vector<64x256xf32>
    %cst_17 = arith.constant dense<0.000000e+00> : vector<16x256xf32>
    %23 = tpu.matmul %0, %22, %cst_17 {dimension_numbers = #tpu.dot_dimension_numbers<[1], [0], [0], [1], [0, 0, 1, 1], [], []>} : vector<16x64xf32>, vector<64x256xf32>, vector<16x256xf32> -> vector<16x256xf32>
    %c0_18 = arith.constant 0 : index
    %c0_19 = arith.constant 0 : index
    %24 = vector.load %arg7[%c0_18, %c0_19] : memref<128x256xf32, #tpu.memory_space<vmem>>, vector<128x256xf32>
    %cst_20 = arith.constant dense<0.000000e+00> : vector<16x256xf32>
    %25 = tpu.matmul %9, %24, %cst_20 {dimension_numbers = #tpu.dot_dimension_numbers<[1], [0], [0], [1], [0, 0, 1, 1], [], []>} : vector<16x128xf32>, vector<128x256xf32>, vector<16x256xf32> -> vector<16x256xf32>
    %26 = arith.addf %23, %25 : vector<16x256xf32>
    %c0_21 = arith.constant 0 : index
    %c0_22 = arith.constant 0 : index
    %27 = vector.load %arg8[%c0_21, %c0_22] : memref<1x256xf32, #tpu.memory_space<vmem>>, vector<1x256xf32>
    %28 = vector.broadcast %27 : vector<1x256xf32> to vector<16x256xf32>
    %29 = arith.addf %26, %28 : vector<16x256xf32>
    %30 = vector.extract_strided_slice %29 {offsets = [0, 0], sizes = [16, 128], strides = [1, 1]} : vector<16x256xf32> to vector<16x128xf32>
    %c0_23 = arith.constant 0 : index
    %c0_24 = arith.constant 0 : index
    %31 = vector.load %arg13[%c0_23, %c0_24] : memref<16x128xf32, #tpu.memory_space<vmem>>, vector<16x128xf32>
    tpu.vector_store %arg13[%c0_23, %c0_24], %30 {strides = array<i32>} : memref<16x128xf32, #tpu.memory_space<vmem>>, vector<16x128xf32>,
    %32 = vector.extract_strided_slice %29 {offsets = [0, 128], sizes = [16, 128], strides = [1, 1]} : vector<16x256xf32> to vector<16x128xf32>
    %33 = arith.addf %32, %21 : vector<16x128xf32>
    %c0_25 = arith.constant 0 : index
    %c0_26 = arith.constant 0 : index
    %34 = vector.load %arg10[%c0_25, %c0_26] : memref<128x128xf32, #tpu.memory_space<vmem>>, vector<128x128xf32>
    %cst_27 = arith.constant dense<0.000000e+00> : vector<16x128xf32>
    %35 = tpu.matmul %33, %34, %cst_27 {dimension_numbers = #tpu.dot_dimension_numbers<[1], [0], [0], [1], [0, 0, 1, 1], [], []>} : vector<16x128xf32>, vector<128x128xf32>, vector<16x128xf32> -> vector<16x128xf32>
    %c0_28 = arith.constant 0 : index
    %c0_29 = arith.constant 0 : index
    %36 = vector.load %arg11[%c0_28, %c0_29] : memref<1x128xf32, #tpu.memory_space<vmem>>, vector<1x128xf32>
    %37 = vector.broadcast %36 : vector<1x128xf32> to vector<16x128xf32>
    %38 = arith.addf %35, %37 : vector<16x128xf32>
    %c0_30 = arith.constant 0 : index
    %c0_31 = arith.constant 0 : index
    %39 = vector.load %arg12[%c0_30, %c0_31] : memref<16x128xf32, #tpu.memory_space<vmem>>, vector<16x128xf32>
    tpu.vector_store %arg12[%c0_30, %c0_31], %38 {strides = array<i32>} : memref<16x128xf32, #tpu.memory_space<vmem>>, vector<16x128xf32>,
    return
  }
  func.func @transform_0(%arg0: i32) -> (i32, i32) {
    %c0_i32 = arith.constant 0 : i32
    %c0_i32_0 = arith.constant 0 : i32
    return %arg0, %c0_i32 : i32, i32
  }
  func.func @transform_1(%arg0: i32) -> (i32, i32) {
    %c0_i32 = arith.constant 0 : i32
    %c0_i32_0 = arith.constant 0 : i32
    return %arg0, %c0_i32 : i32, i32
  }
  func.func @transform_2(%arg0: i32) -> (i32, i32) {
    %c0_i32 = arith.constant 0 : i32
    %c0_i32_0 = arith.constant 0 : i32
    return %arg0, %c0_i32 : i32, i32
  }
  func.func @transform_3(%arg0: i32) -> (i32, i32) {
    %c0_i32 = arith.constant 0 : i32
    %c0_i32_0 = arith.constant 0 : i32
    %c0_i32_1 = arith.constant 0 : i32
    return %c0_i32, %c0_i32_0 : i32, i32
  }
  func.func @transform_4(%arg0: i32) -> (i32, i32) {
    %c0_i32 = arith.constant 0 : i32
    %c0_i32_0 = arith.constant 0 : i32
    %c0_i32_1 = arith.constant 0 : i32
    return %c0_i32, %c0_i32_0 : i32, i32
  }
  func.func @transform_5(%arg0: i32) -> (i32, i32) {
    %c0_i32 = arith.constant 0 : i32
    %c0_i32_0 = arith.constant 0 : i32
    %c0_i32_1 = arith.constant 0 : i32
    return %c0_i32, %c0_i32_0 : i32, i32
  }
  func.func @transform_6(%arg0: i32) -> (i32, i32) {
    %c0_i32 = arith.constant 0 : i32
    %c0_i32_0 = arith.constant 0 : i32
    %c0_i32_1 = arith.constant 0 : i32
    return %c0_i32, %c0_i32_0 : i32, i32
  }
  func.func @transform_7(%arg0: i32) -> (i32, i32) {
    %c0_i32 = arith.constant 0 : i32
    %c0_i32_0 = arith.constant 0 : i32
    %c0_i32_1 = arith.constant 0 : i32
    return %c0_i32, %c0_i32_0 : i32, i32
  }
  func.func @transform_8(%arg0: i32) -> (i32, i32) {
    %c0_i32 = arith.constant 0 : i32
    %c0_i32_0 = arith.constant 0 : i32
    %c0_i32_1 = arith.constant 0 : i32
    return %c0_i32, %c0_i32_0 : i32, i32
  }
  func.func @transform_9(%arg0: i32) -> (i32, i32) {
    %c0_i32 = arith.constant 0 : i32
    %c0_i32_0 = arith.constant 0 : i32
    %c0_i32_1 = arith.constant 0 : i32
    return %c0_i32, %c0_i32_0 : i32, i32
  }
  func.func @transform_10(%arg0: i32) -> (i32, i32) {
    %c0_i32 = arith.constant 0 : i32
    %c0_i32_0 = arith.constant 0 : i32
    %c0_i32_1 = arith.constant 0 : i32
    return %c0_i32, %c0_i32_0 : i32, i32
  }
  func.func @transform_11(%arg0: i32) -> (i32, i32) {
    %c0_i32 = arith.constant 0 : i32
    %c0_i32_0 = arith.constant 0 : i32
    return %arg0, %c0_i32 : i32, i32
  }
  func.func @transform_12(%arg0: i32) -> (i32, i32) {
    %c0_i32 = arith.constant 0 : i32
    %c0_i32_0 = arith.constant 0 : i32
    return %arg0, %c0_i32 : i32, i32
  }
}

</mosaic_0001>

<bundles_post_ra>
// kernel: tpu_custom_call.1
= control target key start
LH: loop header
LB: loop body
LE: loop exit
PB: predicated region body
PF: predicated region fallthrough
CT: control target
= control target key end

     0   :  { %18 = vsyncpa [#allocation3], 0  ;;  %s1458_s0 = inlined_call_operand.hbm [shape: f32[16,64], index: 0, kind: input, shape index: {}]   ;;  %s1459_s1 = inlined_call_operand.hbm [shape: f32[16,32], index: 1, kind: input, shape index: {}]   ;;  %s1460_s2 = inlined_call_operand.hbm [shape: f32[16,9], index: 2, kind: input, shape index: {}]   ;;  %s1461_s3 = inlined_call_operand.hbm [shape: f32[9,128], index: 3, kind: input, shape index: {}]   ;;  %s1462_s4 = inlined_call_operand.vmem [shape: f32[1,128], index: 4, kind: input, shape index: {}]   ;;  %s1463_s5 = inlined_call_operand.hbm [shape: f32[64,256], index: 5, kind: input, shape index: {}]   ;;  %s1464_s6 = inlined_call_operand.hbm [shape: f32[128,256], index: 6, kind: input, shape index: {}]   ;;  %s1465_s7 = inlined_call_operand.vmem [shape: f32[1,256], index: 7, kind: input, shape index: {}]   ;;  %s1466_s8 = inlined_call_operand.hbm [shape: f32[32,128], index: 8, kind: input, shape index: {}]   ;;  %s1467_s9 = inlined_call_operand.hbm [shape: f32[128,128], index: 9, kind: input, shape index: {}]   ;;  %s1468_s10 = inlined_call_operand.vmem [shape: f32[1,128], index: 10, kind: input, shape index: {}]   ;;  %s1469_s11 = inlined_call_operand.hbm [shape: f32[16,128], index: 11, kind: output, shape index: {0}]   ;;  %s1470_s12 = inlined_call_operand.hbm [shape: f32[16,128], index: 12, kind: output, shape index: {1}]  }
   0x1   :  { %19 = vsyncpa [#allocation6], 0 }
   0x2   :  { %20 = vsyncpa [#allocation9], 0 }
   0x3   :  { %21 = vsyncpa [#allocation12], 0 }
   0x4   :  { %22 = vsyncpa [#allocation15], 0 }
   0x5   :  { %23 = vsyncpa [#allocation4], 0 }
   0x6   :  { %24 = vsyncpa [#allocation18], 0  ;;  %s1174_s21 = smov [#allocation5]   ;;  %s1175_s23 = smov [#allocation8]  }
   0x7   :  { %s42_s22 = sshll.u32 %s1174_s21, 4  ;;  %s66_s24 = sshll.u32 %s1175_s23, 4  ;;  %s43_s22 = int_to_ptr.vmem [resolvable:$true] %s42_s22  ;;  %s1255_s24 = int_to_ptr.vmem [resolvable:$true] %s66_s24 }
   0x8   :  { %s940_s27 = scalar_lea.hbm %s1459_s1, 256 }
   0x9   :  { %p941_p0 = scmp.ne.s32.totalorder %s1459_s1, %s940_s27  ;;  %p944_p1 = scmp.lt.u32.totalorder %s940_s27, %s1459_s1 }
   0xb   :  { %p946_p2 = pnand %p944_p1, %p941_p0 }
   0xd   :  { %949 = shalt.err (!%p946_p2)
}
   0xe   :  { %s950_s14 = scalar_lea.vmem %s43_s22, 256  ;;  %p955_p4 = scmp.lt.s32.totalorder %s43_s22, %s43_s22 }
   0xf   :  { %p951_p3 = scmp.ne.s32.totalorder %s43_s22, %s950_s14  ;;  %p956_p5 = scmp.lt.s32.totalorder %s950_s14, %s950_s14 }
  0x11   :  { %p957_p6 = por %p956_p5, %p955_p4 }
  0x13   :  { %p958_p7 = pnand %p957_p6, %p951_p3 }
  0x15   :  { %961 = shalt.err (!%p958_p7)
}
  0x16   :  { %s1176_s15 = smov 128   ;;  %s1177_s16 = smov 8  }
  0x17   :  { %48 = dma.hbm_to_vmem [thread:$0]  %s1459_s1, 256, %s43_s22, [#allocation6], %s1176_s15, %s1176_s15, %s1177_s16  }
  0x18   :  { %s962_s21 = scalar_lea.hbm %s1461_s3, 256 }
  0x19   :  { %p963_p8 = scmp.ne.s32.totalorder %s1461_s3, %s962_s21  ;;  %p966_p9 = scmp.lt.u32.totalorder %s962_s21, %s1461_s3 }
  0x1b   :  { %p968_p10 = pnand %p966_p9, %p963_p8 }
  0x1d   :  { %971 = shalt.err (!%p968_p10)
}
  0x1e   :  { %s972_s28 = scalar_lea.vmem %s1255_s24, 256  ;;  %p977_p12 = scmp.lt.s32.totalorder %s1255_s24, %s1255_s24 }
  0x1f   :  { %p973_p11 = scmp.ne.s32.totalorder %s1255_s24, %s972_s28  ;;  %p978_p13 = scmp.lt.s32.totalorder %s972_s28, %s972_s28 }
  0x21   :  { %p979_p0 = por %p978_p13, %p977_p12 }
  0x23   :  { %p980_p1 = pnand %p979_p0, %p973_p11 }
  0x25   :  { %983 = shalt.err (!%p980_p1)
}
  0x26   :  { %72 = dma.hbm_to_vmem [thread:$0]  %s1461_s3, 256, %s1255_s24, [#allocation9], %s1176_s15, %s1176_s15, %s1177_s16  }
  0x27   :  { %s1178_s29 = smov [#allocation11]   ;;  %s1179_s13 = smov [#allocation2]  }
  0x28   :  { %s92_s30 = sshll.u32 %s1178_s29, 4  ;;  %s30_s14 = sshll.u32 %s1179_s13, 4  ;;  %s93_s30 = int_to_ptr.vmem [resolvable:$true] %s92_s30  ;;  %s1292_s14 = int_to_ptr.vmem [resolvable:$true] %s30_s14 }
  0x29   :  { %s984_s19 = scalar_lea.hbm %s1464_s6, 4096 }
  0x2a   :  { %p985_p2 = scmp.ne.s32.totalorder %s1464_s6, %s984_s19  ;;  %p988_p3 = scmp.lt.u32.totalorder %s984_s19, %s1464_s6 }
  0x2c   :  { %p990_p4 = pnand %p988_p3, %p985_p2 }
  0x2e   :  { %993 = shalt.err (!%p990_p4)
}
  0x2f   :  { %s994_s3 = scalar_lea.vmem %s93_s30, 4096  ;;  %p999_p6 = scmp.lt.s32.totalorder %s93_s30, %s93_s30 }
  0x30   :  { %p995_p5 = scmp.ne.s32.totalorder %s93_s30, %s994_s3  ;;  %p1000_p7 = scmp.lt.s32.totalorder %s994_s3, %s994_s3 }
  0x32   :  { %p1001_p8 = por %p1000_p7, %p999_p6 }
  0x34   :  { %p1002_p9 = pnand %p1001_p8, %p995_p5 }
  0x36   :  { %1005 = shalt.err (!%p1002_p9)
}
  0x37   :  { %s1180_s24 = smov 256   ;;  %s1181_s26 = smov 16  }
  0x38   :  { %98 = dma.hbm_to_vmem [thread:$0]  %s1464_s6, 4096, %s93_s30, [#allocation12], %s1180_s24, %s1180_s24, %s1181_s26  }
  0x39   :  { %s1006_s29 = scalar_lea.hbm %s1458_s0, 256 }
  0x3a   :  { %p1007_p10 = scmp.ne.s32.totalorder %s1458_s0, %s1006_s29  ;;  %p1010_p11 = scmp.lt.u32.totalorder %s1006_s29, %s1458_s0 }
  0x3c   :  { %p1012_p12 = pnand %p1010_p11, %p1007_p10 }
  0x3e   :  { %1015 = shalt.err (!%p1012_p12)
}
  0x3f   :  { %s1016_s20 = scalar_lea.vmem %s1292_s14, 256  ;;  %p1021_p0 = scmp.lt.s32.totalorder %s1292_s14, %s1292_s14 }
  0x40   :  { %p1017_p13 = scmp.ne.s32.totalorder %s1292_s14, %s1016_s20  ;;  %p1022_p1 = scmp.lt.s32.totalorder %s1016_s20, %s1016_s20 }
  0x42   :  { %p1023_p2 = por %p1022_p1, %p1021_p0 }
  0x44   :  { %p1024_p3 = pnand %p1023_p2, %p1017_p13 }
  0x46   :  { %1027 = shalt.err (!%p1024_p3)
}
  0x47   :  { %36 = dma.hbm_to_vmem [thread:$0]  %s1458_s0, 256, %s1292_s14, [#allocation3], %s1176_s15, %s1176_s15, %s1177_s16  }
  0x48   :  { %s1182_s21 = smov [#allocation7]   ;;  %s1183_s25 = smov [#allocation10]  }
  0x49   :  { %s54_s23 = sshll.u32 %s1182_s21, 4  ;;  %s80_s3 = sshll.u32 %s1183_s25, 4  ;;  %s55_s23 = int_to_ptr.vmem [resolvable:$true] %s54_s23  ;;  %s1329_s3 = int_to_ptr.vmem [resolvable:$true] %s80_s3 }
  0x4a   :  { %s1028_s1 = scalar_lea.hbm %s1460_s2, 256 }
  0x4b   :  { %p1029_p4 = scmp.ne.s32.totalorder %s1460_s2, %s1028_s1  ;;  %p1032_p5 = scmp.lt.u32.totalorder %s1028_s1, %s1460_s2 }
  0x4d   :  { %p1034_p6 = pnand %p1032_p5, %p1029_p4 }
  0x4f   :  { %1037 = shalt.err (!%p1034_p6)
}
  0x50   :  { %s1038_s0 = scalar_lea.vmem %s55_s23, 256  ;;  %p1043_p8 = scmp.lt.s32.totalorder %s55_s23, %s55_s23 }
  0x51   :  { %p1039_p7 = scmp.ne.s32.totalorder %s55_s23, %s1038_s0  ;;  %p1044_p9 = scmp.lt.s32.totalorder %s1038_s0, %s1038_s0 }
  0x53   :  { %p1045_p10 = por %p1044_p9, %p1043_p8 }
  0x55   :  { %p1046_p11 = pnand %p1045_p10, %p1039_p7 }
  0x57   :  { %1049 = shalt.err (!%p1046_p11)
}
  0x58   :  { %60 = dma.hbm_to_vmem [thread:$0]  %s1460_s2, 256, %s55_s23, [#allocation6], %s1176_s15, %s1176_s15, %s1177_s16  }
  0x59   :  { %s1050_s6 = scalar_lea.hbm %s1463_s5, 2048 }
  0x5a   :  { %p1051_p12 = scmp.ne.s32.totalorder %s1463_s5, %s1050_s6  ;;  %p1054_p13 = scmp.lt.u32.totalorder %s1050_s6, %s1463_s5 }
  0x5c   :  { %p1056_p0 = pnand %p1054_p13, %p1051_p12 }
  0x5e   :  { %1059 = shalt.err (!%p1056_p0)
}
  0x5f   :  { %s1060_s28 = scalar_lea.vmem %s1329_s3, 2048  ;;  %p1065_p2 = scmp.lt.s32.totalorder %s1329_s3, %s1329_s3 }
  0x60   :  { %p1061_p1 = scmp.ne.s32.totalorder %s1329_s3, %s1060_s28  ;;  %p1066_p3 = scmp.lt.s32.totalorder %s1060_s28, %s1060_s28 }
  0x62   :  { %p1067_p4 = por %p1066_p3, %p1065_p2 }
  0x64   :  { %p1068_p5 = pnand %p1067_p4, %p1061_p1 }
  0x66   :  { %1071 = shalt.err (!%p1068_p5)
}
  0x67   :  { %86 = dma.hbm_to_vmem [thread:$0]  %s1463_s5, 2048, %s1329_s3, [#allocation9], %s1180_s24, %s1180_s24, %s1181_s26  }
  0x68   :  { %s1184_s1 = smov [#allocation13]   ;;  %s1185_s29 = smov [#allocation14]  }
  0x69   :  { %s106_s22 = sshll.u32 %s1184_s1, 4  ;;  %s118_s13 = sshll.u32 %s1185_s29, 4  ;;  %s107_s22 = int_to_ptr.vmem [resolvable:$true] %s106_s22  ;;  %s1366_s13 = int_to_ptr.vmem [resolvable:$true] %s118_s13 }
  0x6a   :  { %s1072_s14 = scalar_lea.hbm %s1466_s8, 512 }
  0x6b   :  { %p1073_p6 = scmp.ne.s32.totalorder %s1466_s8, %s1072_s14  ;;  %p1076_p7 = scmp.lt.u32.totalorder %s1072_s14, %s1466_s8 }
  0x6d   :  { %p1078_p8 = pnand %p1076_p7, %p1073_p6 }
  0x6f   :  { %1081 = shalt.err (!%p1078_p8)
}
  0x70   :  { %s1082_s5 = scalar_lea.vmem %s107_s22, 512  ;;  %p1087_p10 = scmp.lt.s32.totalorder %s107_s22, %s107_s22 }
  0x71   :  { %p1083_p9 = scmp.ne.s32.totalorder %s107_s22, %s1082_s5  ;;  %p1088_p11 = scmp.lt.s32.totalorder %s1082_s5, %s1082_s5 }
  0x73   :  { %p1089_p12 = por %p1088_p11, %p1087_p10 }
  0x75   :  { %p1090_p13 = pnand %p1089_p12, %p1083_p9 }
  0x77   :  { %1093 = shalt.err (!%p1090_p13)
}
  0x78   :  { %112 = dma.hbm_to_vmem [thread:$0]  %s1466_s8, 512, %s107_s22, [#allocation12], %s1176_s15, %s1176_s15, %s1177_s16  }
  0x79   :  { %s1094_s21 = scalar_lea.hbm %s1467_s9, 2048 }
  0x7a   :  { %p1095_p0 = scmp.ne.s32.totalorder %s1467_s9, %s1094_s21  ;;  %p1098_p1 = scmp.lt.u32.totalorder %s1094_s21, %s1467_s9 }
  0x7c   :  { %p1100_p2 = pnand %p1098_p1, %p1095_p0 }
  0x7e   :  { %1103 = shalt.err (!%p1100_p2)
}
  0x7f   :  { %s1104_s23 = scalar_lea.vmem %s1366_s13, 2048  ;;  %p1109_p4 = scmp.lt.s32.totalorder %s1366_s13, %s1366_s13 }
  0x80   :  { %p1105_p3 = scmp.ne.s32.totalorder %s1366_s13, %s1104_s23  ;;  %p1110_p5 = scmp.lt.s32.totalorder %s1104_s23, %s1104_s23 }
  0x82   :  { %p1111_p6 = por %p1110_p5, %p1109_p4 }
  0x84   :  { %p1112_p7 = pnand %p1111_p6, %p1105_p3 }
  0x86   :  { %1115 = shalt.err (!%p1112_p7)
}
  0x87   :  { %124 = dma.hbm_to_vmem [thread:$0]  %s1467_s9, 2048, %s1366_s13, [#allocation15], %s1176_s15, %s1176_s15, %s1177_s16  }
  0x88   :  { %1160 = dma.done.wait [#allocation3], 256  }
  0x89   :  { %1161 = vsyncadd [#allocation3], 4294967040 }
  0x8a   :  { %1162 = dma.done.wait [#allocation6], 512  }
  0x8b   :  { %1163 = vsyncadd [#allocation6], 4294966784 }
  0x8c   :  { %1164 = dma.done.wait [#allocation9], 2304  }
  0x8d   :  { %1165 = vsyncadd [#allocation9], 4294964992 }
  0x8e   :  { %1166 = dma.done.wait [#allocation12], 4608  }
  0x8f   :  { %1167 = vsyncadd [#allocation12], 4294962688 }
  0x90   :  { %1168 = dma.done.wait [#allocation15], 2048  }
  0x91   :  { %1169 = vsyncadd [#allocation15], 4294965248  ;;  %vm173_vm0 = vcmask 1040384   ;;  %vm166_vm1 = vcmask 72704   ;;  %vm1186_vm2 = vmmov 1   ;;  %vm254_vm4 = vcmask 261120  }
  0x92   :  { %vm819_vm3 = vmpackc.low %vm173_vm0, %vm1186_vm2  ;;  %v157_v0 = vld [vmem:[#allocation8] sm:$0xff]  ;;  %v158_v1 = vld [vmem:[#allocation8 + $0x8] sm:$0x1]  ;;  %vm487_vm5 = vcmask 523264  }
  0x93   :  { %v155_v2 = vld [vmem:[#allocation7] sm:$0xff]  ;;  %v818_v3 = vpack.c.bf16 %v158_v1, %v157_v0  ;;  %v1404_v4 = vld [vmem:[#allocation5] sm:$0xff]  ;;  %v1406_v5 = vld [vmem:[#allocation5 + $0x8] sm:$0xff] }
  0x94   :  { %769 = vmatprep.mubr.msk.f32.mxu1 %vm166_vm1, %v155_v2  ;;  %v255_v6 = vsel %vm254_vm4, %v1404_v4, -inf  ;;  %v156_v7 = vld [vmem:[#allocation7 + $0x8] sm:$0xff]  ;;  %v258_v8 = vsel %vm254_vm4, %v1406_v5, -inf  ;;  %v275_v9 = vld [vmem:[#allocation13] sm:$0xff]  ;;  %v277_v11 = vld [vmem:[#allocation13 + $0x10] sm:$0xff]  ;;  %v1187_v2 = vmov 0.0  }
  0x95   :  { %820 = vmatprep.subr.msk.bf16.mxu1 %vm819_vm3, %v818_v3  ;;  %256 = vmax.xlane.f32.xlu0 %v255_v6  ;;  %v276_v10 = vld [vmem:[#allocation13 + $0x8] sm:$0xff]  ;;  %v278_v13 = vld [vmem:[#allocation13 + $0x18] sm:$0xff]  ;;  %v378_v17 = vld [vmem:[#allocation11] sm:$0xff] }
  0x96   :  { %823 = vmatpush3.bf16.msk.msra.mxu1 %vm819_vm3, %v818_v3  ;;  %v824_v12 = vpack.c.bf16 %v276_v10, %v275_v9  ;;  %v828_v14 = vpack.c.bf16 %v278_v13, %v277_v11  ;;  %v379_v15 = vld [vmem:[#allocation11 + $0x8] sm:$0xff]  ;;  %v381_v16 = vld [vmem:[#allocation11 + $0x18] sm:$0xff]  ;;  %v380_v19 = vld [vmem:[#allocation11 + $0x10] sm:$0xff]  ;;  %474 = vmatprep.mubr.f32.mxu0 %v1187_v2 }
  0x97   :  { %v832_v18 = vpack.c.bf16 %v381_v16, %v379_v15  ;;  %v383_v20 = vld [vmem:[#allocation11 + $0x28] sm:$0xff]  ;;  %v385_v21 = vld [vmem:[#allocation11 + $0x38] sm:$0xff]  ;;  %v834_v22 = vpack.c.bf16 %v380_v19, %v378_v17  ;;  %v382_v24 = vld [vmem:[#allocation11 + $0x20] sm:$0xff] }
  0x98   :  { %825 = vmatprep.subr.bf16.mxu1 %v824_v12  ;;  %v836_v23 = vpack.c.bf16 %v385_v21, %v383_v20  ;;  %v384_v25 = vld [vmem:[#allocation11 + $0x30] sm:$0xff]  ;;  %v387_v26 = vld [vmem:[#allocation11 + $0x48] sm:$0xff]  ;;  %v389_v27 = vld [vmem:[#allocation11 + $0x58] sm:$0xff] }
  0x99   :  { %770 = vmatmul.mubr.msk.f32.vlgmr.msra.gmra.mrb[0].mxu1 %vm166_vm1, %v156_v7  ;;  %259 = vmax.xlane.f32.xlu0 %v258_v8  ;;  %v838_v28 = vpack.c.bf16 %v384_v25, %v382_v24  ;;  %v840_v29 = vpack.c.bf16 %v389_v27, %v387_v26  ;;  %v386_v30 = vld [vmem:[#allocation11 + $0x40] sm:$0xff]  ;;  %v388_v31 = vld [vmem:[#allocation11 + $0x50] sm:$0xff]  ;;  %v391_v32 = vld [vmem:[#allocation11 + $0x68] sm:$0xff] }
  0x9a   :  { %827 = vmatpush3.bf16.msra.mxu1 %v824_v12  ;;  %833 = vmatprep.subr.bf16.mxu0 %v832_v18  ;;  %v393_v33 = vld [vmem:[#allocation11 + $0x78] sm:$0xff]  ;;  %v842_v34 = vpack.c.bf16 %v388_v31, %v386_v30  ;;  %v390_v36 = vld [vmem:[#allocation11 + $0x60] sm:$0xff]  ;;  %v392_v37 = vld [vmem:[#allocation11 + $0x70] sm:$0xff] }
  0x9b   :  { %829 = vmatprep.subr.bf16.mxu1 %v828_v14  ;;  %835 = vmatpush1.bf16.msra.mxu0 %v834_v22  ;;  %v844_v35 = vpack.c.bf16 %v393_v33, %v391_v32  ;;  %v395_v38 = vld [vmem:[#allocation11 + $0x88] sm:$0xff]  ;;  %v397_v39 = vld [vmem:[#allocation11 + $0x98] sm:$0xff]  ;;  %v846_v40 = vpack.c.bf16 %v392_v37, %v390_v36  ;;  %v394_v42 = vld [vmem:[#allocation11 + $0x80] sm:$0xff] }
  0x9c   :  { %837 = vmatprep.subr.bf16.mxu0 %v836_v23  ;;  %v848_v41 = vpack.c.bf16 %v397_v39, %v395_v38  ;;  %v396_v43 = vld [vmem:[#allocation11 + $0x90] sm:$0xff]  ;;  %v399_v44 = vld [vmem:[#allocation11 + $0xa8] sm:$0xff]  ;;  %v401_v45 = vld [vmem:[#allocation11 + $0xb8] sm:$0xff] }
  0x9d   :  { %v850_v46 = vpack.c.bf16 %v396_v43, %v394_v42  ;;  %v852_v47 = vpack.c.bf16 %v401_v45, %v399_v44  ;;  %v398_v48 = vld [vmem:[#allocation11 + $0xa0] sm:$0xff]  ;;  %v400_v49 = vld [vmem:[#allocation11 + $0xb0] sm:$0xff]  ;;  %v403_v50 = vld [vmem:[#allocation11 + $0xc8] sm:$0xff] }
  0x9e   :  { %831 = vmatpush3.bf16.msra.mxu1 %v828_v14  ;;  %v405_v51 = vld [vmem:[#allocation11 + $0xd8] sm:$0xff]  ;;  %v854_v52 = vpack.c.bf16 %v400_v49, %v398_v48  ;;  %v402_v54 = vld [vmem:[#allocation11 + $0xc0] sm:$0xff]  ;;  %v404_v55 = vld [vmem:[#allocation11 + $0xd0] sm:$0xff] }
  0x9f   :  { %839 = vmatpush1.bf16.msra.mxu0 %v838_v28  ;;  %v856_v53 = vpack.c.bf16 %v405_v51, %v403_v50  ;;  %v858_v56 = vpack.c.bf16 %v404_v55, %v402_v54  ;;  %v407_v57 = vld [vmem:[#allocation11 + $0xe8] sm:$0xff]  ;;  %v409_v58 = vld [vmem:[#allocation11 + $0xf8] sm:$0xff]  ;;  %v406_v60 = vld [vmem:[#allocation11 + $0xe0] sm:$0xff] }
  0xa0   :  { %841 = vmatprep.subr.bf16.mxu0 %v840_v29  ;;  %v860_v59 = vpack.c.bf16 %v409_v58, %v407_v57  ;;  %v408_v61 = vld [vmem:[#allocation11 + $0xf0] sm:$0xff]  ;;  %v363_v63 = vld [vmem:[#allocation10 + $0x8] sm:$0xff]  ;;  %v365_v0 = vld [vmem:[#allocation10 + $0x18] sm:$0xff] }
  0xa1   :  { %v862_v62 = vpack.c.bf16 %v408_v61, %v406_v60  ;;  %v864_v1 = vpack.c.bf16 %v365_v0, %v363_v63  ;;  %v364_v16 = vld [vmem:[#allocation10 + $0x10] sm:$0xff]  ;;  %v367_v18 = vld [vmem:[#allocation10 + $0x28] sm:$0xff]  ;;  %v369_v19 = vld [vmem:[#allocation10 + $0x38] sm:$0xff] }
  0xa2   :  { %v868_v24 = vpack.c.bf16 %v369_v19, %v367_v18  ;;  %v366_v25 = vld [vmem:[#allocation10 + $0x20] sm:$0xff]  ;;  %v368_v26 = vld [vmem:[#allocation10 + $0x30] sm:$0xff]  ;;  %v371_v27 = vld [vmem:[#allocation10 + $0x48] sm:$0xff] }
  0xa3   :  { %843 = vmatpush1.bf16.msra.mxu0 %v842_v34  ;;  %v373_v28 = vld [vmem:[#allocation10 + $0x58] sm:$0xff]  ;;  %v870_v29 = vpack.c.bf16 %v368_v26, %v366_v25  ;;  %v370_v32 = vld [vmem:[#allocation10 + $0x40] sm:$0xff]  ;;  %v372_v33 = vld [vmem:[#allocation10 + $0x50] sm:$0xff] }
  0xa4   :  { %845 = vmatprep.subr.bf16.mxu0 %v844_v35  ;;  %v872_v31 = vpack.c.bf16 %v373_v28, %v371_v27  ;;  %v375_v34 = vld [vmem:[#allocation10 + $0x68] sm:$0xff]  ;;  %v377_v35 = vld [vmem:[#allocation10 + $0x78] sm:$0xff]  ;;  %v874_v36 = vpack.c.bf16 %v372_v33, %v370_v32  ;;  %v374_v38 = vld [vmem:[#allocation10 + $0x60] sm:$0xff] }
  0xa5   :  { %v876_v37 = vpack.c.bf16 %v377_v35, %v375_v34  ;;  %v376_v39 = vld [vmem:[#allocation10 + $0x70] sm:$0xff]  ;;  %v152_v42 = vld [vmem:[#allocation2 + $0x8] sm:$0xff]  ;;  %v591_v43 = vld [vmem:[#allocation14] sm:$0xff] }
  0xa6   :  { %v592_v44 = vld [vmem:[#allocation14 + $0x8] sm:$0xff]  ;;  %v593_v45 = vld [vmem:[#allocation14 + $0x10] sm:$0xff]  ;;  %v595_v49 = vld [vmem:[#allocation14 + $0x20] sm:$0xff] }
  0xa7   :  { %847 = vmatpush1.bf16.msra.mxu0 %v846_v40  ;;  %v878_v40 = vpack.c.bf16 %v376_v39, %v374_v38  ;;  %v596_v50 = vld [vmem:[#allocation14 + $0x28] sm:$0xff]  ;;  %v599_v55 = vld [vmem:[#allocation14 + $0x40] sm:$0xff]  ;;  %v601_v58 = vld [vmem:[#allocation14 + $0x50] sm:$0xff] }
  0xa8   :  { %849 = vmatprep.subr.bf16.mxu0 %v848_v41  ;;  %v151_v41 = vld [vmem:[#allocation2] sm:$0xff]  ;;  %v888_v51 = vpack.c.bf16 %v596_v50, %v595_v49  ;;  %v605_v0 = vld [vmem:[#allocation14 + $0x70] sm:$0xff] }
  0xa9   :  { %v603_v61 = vld [vmem:[#allocation14 + $0x60] sm:$0xff] }
  0xab   :  { %851 = vmatpush1.bf16.msra.mxu0 %v850_v46  ;;  %v880_v46 = vpack.c.bf16 %v592_v44, %v591_v43 }
  0xac   :  { %853 = vmatprep.subr.bf16.mxu0 %v852_v47  ;;  %v594_v47 = vld [vmem:[#allocation14 + $0x18] sm:$0xff] }
  0xad   :  { %v884_v48 = vpack.c.bf16 %v594_v47, %v593_v45  ;;  %881 = vmatprep.subr.bf16.mxu1 %v880_v46 }
  0xaf   :  { %855 = vmatpush1.bf16.msra.mxu0 %v854_v52  ;;  %v597_v52 = vld [vmem:[#allocation14 + $0x30] sm:$0xff] }
  0xb0   :  { %857 = vmatprep.subr.bf16.mxu0 %v856_v53  ;;  %v598_v53 = vld [vmem:[#allocation14 + $0x38] sm:$0xff] }
  0xb1   :  { %v892_v54 = vpack.c.bf16 %v598_v53, %v597_v52 }
  0xb3   :  { %859 = vmatpush1.bf16.msra.mxu0 %v858_v56  ;;  %v600_v56 = vld [vmem:[#allocation14 + $0x48] sm:$0xff] }
  0xb4   :  { %861 = vmatprep.subr.bf16.mxu0 %v860_v59  ;;  %v896_v57 = vpack.c.bf16 %v600_v56, %v599_v55  ;;  %v602_v59 = vld [vmem:[#allocation14 + $0x58] sm:$0xff] }
  0xb5   :  { %v900_v60 = vpack.c.bf16 %v602_v59, %v601_v58 }
  0xb7   :  { %863 = vmatpush1.bf16.msra.mxu0 %v862_v62  ;;  %v604_v62 = vld [vmem:[#allocation14 + $0x68] sm:$0xff] }
  0xb8   :  { %865 = vmatprep.subr.bf16.mxu0 %v864_v1  ;;  %v904_v63 = vpack.c.bf16 %v604_v62, %v603_v61  ;;  %v606_v1 = vld [vmem:[#allocation14 + $0x78] sm:$0xff] }
 0x122   :  { %v257_v3 = vpop.xlane.xlu0 %256 }
 0x123   :  { %v261_v6 = vsub.f32 %v1404_v4, %v257_v3  ;;  %v728_v4 = vld [vmem:[%s1462_s4] ss:$0 sm:$0xff] }
 0x125   :  { %v263_v7 = vmul.f32 1.442695, %v261_v6 }
 0x126   :  { %v260_v8 = vpop.xlane.xlu0 %259 }
 0x127   :  { %932 = vpow2.f32 %v263_v7  ;;  %v262_v9 = vsub.f32 %v1406_v5, %v260_v8  ;;  %v362_v5 = vld [vmem:[#allocation10] sm:$0xff]  ;;  %v573_v8 = vlaneseq }
 0x128   :  { %v866_v21 = vpack.c.bf16 %v364_v16, %v362_v5 }
 0x129   :  { %v265_v10 = vmul.f32 1.442695, %v262_v9  ;;  %v574_v9 = vshrl.u32 %v573_v8, 7 }
 0x12b   :  { %934 = vpow2.f32 %v265_v10 }
 0x131   :  { %v933_v11 = vpop.eup %932 }
 0x132   :  { %780 = vmatprep.mubr.msk.f32.mxu1 %vm254_vm4, %v933_v11  ;;  %v267_v12 = vsel %vm254_vm4, %v933_v11, 0.0  ;;  %v575_v11 = vsub.s32 0, %v574_v9 }
 0x133   :  { %268 = vadd.xlane.f32.xlu1 %v267_v12  ;;  %v571_v12 = vld [vmem:[%s1465_s7] sm:$0x3]  ;;  %s1188_s7 = smov [#allocation17]  }
 0x134   :  { %s708_s13 = sshll.u32 %s1188_s7, 4  ;;  %s709_s13 = int_to_ptr.vmem [resolvable:$true] %s708_s13 }
 0x135   :  { %v935_v13 = vpop.eup %934  ;;  %s1116_s17 = scalar_lea.vmem %s709_s13, 256  ;;  %p1121_p9 = scmp.lt.s32.totalorder %s709_s13, %s709_s13 }
 0x136   :  { %781 = vmatmul.mubr.msk.f32.vlgmr.msra.gmra.mrb[2].mxu1 %vm254_vm4, %v935_v13  ;;  %v270_v14 = vsel %vm254_vm4, %v935_v13, 0.0  ;;  %v579_v13 = vsub.s32 1, %v574_v9  ;;  %p1117_p8 = scmp.ne.s32.totalorder %s709_s13, %s1116_s17  ;;  %p1122_p10 = scmp.lt.s32.totalorder %s1116_s17, %s1116_s17 }
 0x137   :  { %271 = vadd.xlane.f32.xlu1 %v270_v14  ;;  %883 = vmatpush3.bf16.msra.mxu1 %v880_v46  ;;  %v576_v14 = vrot.slane %v571_v12, %v575_v11 }
 0x138   :  { %885 = vmatprep.subr.bf16.mxu1 %v884_v48  ;;  %p1123_p11 = por %p1122_p10, %p1121_p9 }
 0x13a   :  { %p1124_p12 = pnand %p1123_p11, %p1117_p8 }
 0x13b   :  { %887 = vmatpush3.bf16.msra.mxu1 %v884_v48 }
 0x13c   :  { %889 = vmatprep.subr.bf16.mxu1 %v888_v51 }
 0x13f   :  { %891 = vmatpush3.bf16.msra.mxu1 %v888_v51 }
 0x140   :  { %893 = vmatprep.subr.bf16.mxu1 %v892_v54 }
 0x143   :  { %895 = vmatpush3.bf16.msra.mxu1 %v892_v54 }
 0x144   :  { %897 = vmatprep.subr.bf16.mxu1 %v896_v57 }
 0x147   :  { %899 = vmatpush3.bf16.msra.mxu1 %v896_v57 }
 0x148   :  { %901 = vmatprep.subr.bf16.mxu1 %v900_v60 }
 0x14b   :  { %903 = vmatpush3.bf16.msra.mxu1 %v900_v60 }
 0x14c   :  { %905 = vmatprep.subr.bf16.mxu1 %v904_v63 }
 0x14f   :  { %907 = vmatpush3.bf16.msra.mxu1 %v904_v63 }
 0x16c   :  { %v771_v15 = vpop.f32.mrb[0].mxu1 }
 0x16d   :  { %v243_v17 = vpop.f32.mrb[1].mxu1  ;;  %v249_v22 = vadd.f32 %v771_v15, %v728_v4 }
 0x16e   :  { %v244_v20 = vadd.f32 %v728_v4, %v243_v17  ;;  %v580_v4 = vrot.slane %v571_v12, %v579_v13 }
 0x16f   :  { %v253_v30 = vmax.f32 %v249_v22, 0.0 }
 0x170   :  { %v252_v23 = vmax.f32 %v244_v20, 0.0 }
 0x172   :  { %475 = vmatmul.mubr.f32.vlgmr.msra.gmra.mrb[0].mxu0 %v252_v23 }
 0x173   :  { %867 = vmatpush1.bf16.msra.mxu0 %v866_v21  ;;  %480 = vmatprep.mubr.f32.mxu0 %v1187_v2 }
 0x174   :  { %869 = vmatprep.subr.bf16.mxu0 %v868_v24 }
 0x176   :  { %481 = vmatmul.mubr.f32.gmra.mrb[2].mxu0 %v253_v30 }
 0x177   :  { %871 = vmatpush1.bf16.msra.mxu0 %v870_v29  ;;  %558 = vmatprep.mubr.f32.mxu0 %v1187_v2 }
 0x178   :  { %873 = vmatprep.subr.bf16.mxu0 %v872_v31 }
 0x17b   :  { %875 = vmatpush1.bf16.msra.mxu0 %v874_v36 }
 0x17c   :  { %877 = vmatprep.subr.bf16.mxu0 %v876_v37 }
 0x17f   :  { %879 = vmatpush1.bf16.msra.mxu0 %v878_v40 }
 0x182   :  { %734 = vmatmul.mubr.msk.f32.vlgmr.msra.gmra.mrb[0].mxu0 %vm487_vm5, %v151_v41 }
 0x183   :  { %564 = vmatprep.mubr.f32.mxu0 %v1187_v2  ;;  %v908_v2 = vpack.c.bf16 %v606_v1, %v605_v0 }
 0x185   :  { %909 = vmatprep.subr.bf16.mxu1 %v908_v2 }
 0x186   :  { %735 = vmatmul.mubr.msk.f32.gmra.mrb[2].mxu0 %vm487_vm5, %v152_v42  ;;  %911 = vmatpush3.bf16.msra.mxu1 %v908_v2 }
 0x1c0   :  { %v269_v7 = vpop.xlane.xlu1 %268 }
 0x1c1   :  { %936 = vrcp.f32 %v269_v7 }
 0x1c4   :  { %v272_v10 = vpop.xlane.xlu1 %271 }
 0x1c5   :  { %938 = vrcp.f32 %v272_v10 }
 0x1cb   :  { %v937_v15 = vpop.eup %936 }
 0x1cf   :  { %v939_v20 = vpop.eup %938 }
 0x209   :  { %v782_v3 = vpop.f32.mrb[2].mxu1 }
 0x20a   :  { %v351_v6 = vpop.f32.mrb[3].mxu1  ;;  %v361_v25 = vmul.f32 %v939_v20, %v782_v3 }
 0x20b   :  { %v360_v18 = vmul.f32 %v937_v15, %v351_v6 }
 0x255   :  { %v560_v5 = vpop.f32.mrb[0].mxu0 }
 0x256   :  { %v583_v16 = vadd.f32 %v576_v14, %v560_v5  ;;  %v562_v17 = vpop.f32.mrb[1].mxu0 }
 0x257   :  { %v584_v19 = vadd.f32 %v580_v4, %v562_v17 }
 0x258   :  { %587 = vst [vmem:[#allocation17] sm:$0xff] %v583_v16 }
 0x259   :  { %v589_v21 = vadd.f32 %v584_v19, %v360_v18  ;;  %v566_v22 = vpop.f32.mrb[2].mxu0 }
 0x25a   :  { %v585_v23 = vadd.f32 %v576_v14, %v566_v22  ;;  %v568_v24 = vpop.f32.mrb[3].mxu0 }
 0x25b   :  { %v586_v26 = vadd.f32 %v580_v4, %v568_v24  ;;  %815 = vmatprep.mubr.f32.mxu1 %v589_v21 }
 0x25c   :  { %588 = vst [vmem:[#allocation17 + $0x8] sm:$0xff] %v585_v23 }
 0x25d   :  { %v590_v27 = vadd.f32 %v586_v26, %v361_v25 }
 0x25f   :  { %816 = vmatmul.mubr.f32.vlgmr.msra.gmra.mrb[4].mxu1 %v590_v27 }
 0x260   :  { %1127 = shalt.err (!%p1124_p12)
}
 0x261   :  { %s1128_s18 = scalar_lea.hbm %s1470_s12, 256 }
 0x262   :  { %p1129_p13 = scmp.ne.s32.totalorder %s1470_s12, %s1128_s18  ;;  %p1132_p0 = scmp.lt.u32.totalorder %s1128_s18, %s1470_s12 }
 0x264   :  { %p1134_p1 = pnand %p1132_p0, %p1129_p13 }
 0x266   :  { %1137 = shalt.err (!%p1134_p1)
}
 0x267   :  { %714 = dma.vmem_to_hbm [thread:$0]  %s709_s13, 256, %s1470_s12, [#allocation18], %s1176_s15, %s1176_s15, %s1177_s16  }
 0x268   :  { %v736_v28 = vld [vmem:[%s1468_s10] ss:$0 sm:$0xff]  ;;  %s1189_s21 = smov [#allocation16]  }
 0x269   :  { %s696_s25 = sshll.u32 %s1189_s21, 4  ;;  %s697_s25 = int_to_ptr.vmem [resolvable:$true] %s696_s25 }
 0x26a   :  { %s1138_s27 = scalar_lea.vmem %s697_s25, 256  ;;  %p1143_p3 = scmp.lt.s32.totalorder %s697_s25, %s697_s25 }
 0x26b   :  { %p1139_p2 = scmp.ne.s32.totalorder %s697_s25, %s1138_s27  ;;  %p1144_p4 = scmp.lt.s32.totalorder %s1138_s27, %s1138_s27 }
 0x26d   :  { %p1145_p5 = por %p1144_p4, %p1143_p3 }
 0x26f   :  { %p1146_p6 = pnand %p1145_p5, %p1139_p2 }
 0x332   :  { %v817_v29 = vpop.f32.mrb[4].mxu1 }
 0x333   :  { %v686_v30 = vadd.f32 %v817_v29, %v736_v28  ;;  %v680_v31 = vpop.f32.mrb[5].mxu1 }
 0x334   :  { %v681_v32 = vadd.f32 %v736_v28, %v680_v31 }
 0x335   :  { %690 = vst [vmem:[#allocation16 + $0x8] sm:$0xff] %v686_v30 }
 0x336   :  { %689 = vst [vmem:[#allocation16] sm:$0xff] %v681_v32 }
 0x337   :  { %1149 = shalt.err (!%p1146_p6)
}
 0x338   :  { %s1150_s10 = scalar_lea.hbm %s1469_s11, 256 }
 0x339   :  { %p1151_p7 = scmp.ne.s32.totalorder %s1469_s11, %s1150_s10  ;;  %p1154_p8 = scmp.lt.u32.totalorder %s1150_s10, %s1469_s11 }
 0x33b   :  { %p1156_p9 = pnand %p1154_p8, %p1151_p7 }
 0x33d   :  { %1159 = shalt.err (!%p1156_p9)
}
 0x33e   :  { %702 = dma.vmem_to_hbm [thread:$0]  %s697_s25, 256, %s1469_s11, [#allocation4], %s1176_s15, %s1176_s15, %s1177_s16  }
 0x33f   :  { %1170 = dma.done.wait [#allocation4], 256  }
 0x340   :  { %1171 = vsyncadd [#allocation4], 4294967040 }
 0x341   :  { %1172 = dma.done.wait [#allocation18], 256  }
 0x342   :  { %1173 = vsyncadd [#allocation18], 4294967040 }
 0x343   :  { %721 = vsyncpa [#allocation3], 1 }
 0x344   :  { %722 = vsyncpa [#allocation6], 1 }
 0x345   :  { %723 = vsyncpa [#allocation9], 1 }
 0x346   :  { %724 = vsyncpa [#allocation12], 1 }
 0x347   :  { %725 = vsyncpa [#allocation15], 1 }
 0x348   :  { %726 = vsyncpa [#allocation4], 1 }
 0x349   :  { %727 = vsyncpa [#allocation18], 1 }

</bundles_post_ra>
